<compile_context>
chip_gen: v6e
topology: v6e:2x2x1
jax: 0.10.0
libtpu: 0.0.40
codegen_flags: <defaults>
</compile_context>

<pallas_src>
import numpy as np
import jax
import jax.numpy as jnp
from jax.experimental import pallas as pl
from jax.experimental.pallas import tpu as pltpu

# ----------------- configuration (DMPNet / DMPMLPBase defaults, small sizes) ----
B            = 2
NUM_INPUTS   = 32                 # must be >= 31 (vel_index = arange(22, 31))
HIDDEN_SIZE  = 32                 # critic hidden_size -> critic width 3*H = 96
HIDDEN_SIZES = (32, 32)           # actor MLP hidden_sizes
T_STEPS      = 10                 # T
N_BASIS      = 5                  # N
L_SUB        = 10                 # l
TAU          = 1.0
A_X          = 1.0
A_Z          = 25.0               # a_z
STATE_LO, STATE_HI = 7, 16        # state_index = arange(7, 16)
VEL_LO, VEL_HI     = 22, 31       # vel_index   = arange(22, 31)
DIM          = STATE_HI - STATE_LO            # 9 dofs
OUTPUT_SIZE  = N_BASIS * DIM + DIM            # 54
DT           = TAU / (T_STEPS * L_SUB)
TIMESTEPS    = int(round(TAU / DT)) + 1       # T*l + 1 = 101
DT_EFF       = DT * TAU
CRITIC_W     = 3 * HIDDEN_SIZE                # 96
TRUNK_W      = CRITIC_W + HIDDEN_SIZES[0]     # 128  (critic | actor lanes)
COMB_W       = OUTPUT_SIZE + 1                # 55   (actor raw output | critic value)
ACT_FLAT     = DIM * T_STEPS                  # 90


def _vmem_specs(n):
    return [pl.BlockSpec(memory_space=pltpu.MemorySpace.VMEM) for _ in range(n)]


# --------------------------------- fused Pallas kernel ---------------------------
def fused_kernel(x_ref, w1_ref, b1_ref, w2_ref, b2_ref, w3_ref, b3_ref,
                 ev_ref, ex_ref, ec_ref, mf_ref, eg_ref, ey_ref,
                 critic_ref, actor_ref):
    f32 = jnp.float32
    x = x_ref[...]                                                          # [B, 32]

    # fused trunk: critic lanes [0:96), actor lanes [96:128) (W2 is block-diagonal)
    h = jnp.tanh(jnp.dot(x, w1_ref[...], preferred_element_type=f32) + b1_ref[...])
    h = jnp.tanh(jnp.dot(h, w2_ref[...], preferred_element_type=f32) + b2_ref[...])
    comb = jnp.dot(h, w3_ref[...], preferred_element_type=f32) + b3_ref[...]  # [B, 55]
    # comb[:, :54] = actor last_fc output (pre *100), comb[:, 54] = critic value.

    # critic(x).repeat(1, T): EV picks lane 54 and broadcasts it over T columns.
    critic_ref[...] = jnp.dot(comb, ev_ref[...], preferred_element_type=f32)  # [B, T]

    # DMP 'int_path' + ::l decimation + diff, collapsed to a closed-form affine map
    # (constant matrices precomputed on host; *100 scaling and the state/vel index
    #  gathers from x are folded into the matrices, so no in-kernel slicing).
    lin = (jnp.dot(x, ex_ref[...], preferred_element_type=f32)       # d_alpha*y0 + d_beta*z0
           + jnp.dot(comb, ec_ref[...], preferred_element_type=f32)) # + d_gamma*goal
    fw = jnp.dot(comb, mf_ref[...], preferred_element_type=f32)      # sum_n dP[m,n]*w[b,d,n]
    amp = (jnp.dot(comb, eg_ref[...], preferred_element_type=f32)    # goal
           - jnp.dot(x, ey_ref[...], preferred_element_type=f32))    # - y0
    actor_ref[...] = lin + fw * amp                                   # [B, DIM*T]


def fused_forward_call(x, fused):
    return pl.pallas_call(
        fused_kernel,
        out_shape=(jax.ShapeDtypeStruct((x.shape[0], T_STEPS), jnp.float32),
                   jax.ShapeDtypeStruct((x.shape[0], ACT_FLAT), jnp.float32)),
        in_specs=_vmem_specs(13),
        out_specs=(pl.BlockSpec(memory_space=pltpu.MemorySpace.VMEM),
                   pl.BlockSpec(memory_space=pltpu.MemorySpace.VMEM)),
    )(x, *fused)


# --------------------------------- host-side precomputation ----------------------
def _dmp_basis():
    # gaussian RBF basis per timestep, pre-scaled by x_i / sum_k psi_i[k]
    c = np.exp(-A_X * np.linspace(0.0, 1.0, N_BASIS))
    sigma2 = np.ones(N_BASIS) * (N_BASIS ** 1.5) / c / A_X
    x_seq = (1.0 - A_X * DT / TAU) ** np.arange(TIMESTEPS - 1)
    psi = np.exp(-0.5 * (x_seq[:, None] - c[None, :]) ** 2 / sigma2[None, :])
    return psi * (x_seq / psi.sum(axis=1))[:, None]                   # [T*l, N]


def _dmp_affine_coeffs():
    """Exact collapse of the forward-Euler DMP recursion.

    y_i = alpha_i*y0 + beta_i*z0 + gamma_i*goal + (P_i . w_row)*(goal - y0)
    Returns the finite differences of (alpha, beta, gamma, P) at the decimated
    sample indices 0, l, 2l, ..., T*l (i.e. exactly y[(m+1)l] - y[ml]).
    """
    K = A_Z * A_Z * DT_EFF / 4.0
    A = np.array([[1.0, DT_EFF], [-K, 1.0 - A_Z * DT_EFF]], dtype=np.float64)
    powers = np.zeros((TIMESTEPS, 2, 2))
    powers[0] = np.eye(2)
    for i in range(1, TIMESTEPS):
        powers[i] = powers[i - 1] @ A
    alpha = powers[:, 0, 0]
    beta = powers[:, 0, 1]
    gamma = K * np.concatenate([[0.0], np.cumsum(beta[:-1])])
    psi_scaled = _dmp_basis()
    P = np.zeros((TIMESTEPS, N_BASIS))
    for i in range(1, TIMESTEPS):
        P[i] = DT_EFF * (beta[i - 1::-1, None] * psi_scaled[:i]).sum(axis=0)
    idx = np.arange(0, TIMESTEPS, L_SUB)                               # 0, l, ..., T*l
    return (np.diff(alpha[idx]), np.diff(beta[idx]),
            np.diff(gamma[idx]), np.diff(P[idx], axis=0))


def _build_fused_constants(d_alpha, d_beta, d_gamma, dP):
    EV = np.zeros((COMB_W, T_STEPS));   EV[OUTPUT_SIZE, :] = 1.0
    EX = np.zeros((NUM_INPUTS, ACT_FLAT))
    EC = np.zeros((COMB_W, ACT_FLAT))
    MF = np.zeros((COMB_W, ACT_FLAT))
    EG = np.zeros((COMB_W, ACT_FLAT))
    EY = np.zeros((NUM_INPUTS, ACT_FLAT))
    for d in range(DIM):
        cols = slice(d * T_STEPS, (d + 1) * T_STEPS)
        EX[STATE_LO + d, cols] = d_alpha
        EX[VEL_LO + d, cols] = d_beta * TAU          # z0 = dy0 * tau
        EC[d, cols] = d_gamma * 100.0                # goal = 100 * comb[:, d]
        EG[d, cols] = 100.0
        EY[STATE_LO + d, cols] = 1.0
        for n in range(N_BASIS):
            MF[DIM + d * N_BASIS + n, cols] = dP[:, n] * 100.0   # dof-major w layout
    return EV, EX, EC, MF, EG, EY


def make_params(key):
    keys = jax.random.split(key, 6)

    def fanin(k, din, dout):
        bound = 1.0 / np.sqrt(din)
        return np.asarray(jax.random.uniform(k, (din, dout), jnp.float32, -bound, bound),
                          np.float64)

    # actor trunk (DMPNet.fcs): fanin init, bias 0.1; last_fc: small init, bias 0
    a_w0 = fanin(keys[0], NUM_INPUTS, HIDDEN_SIZES[0]); a_b0 = np.full(HIDDEN_SIZES[0], 0.1)
    a_w1 = fanin(keys[1], HIDDEN_SIZES[0], HIDDEN_SIZES[1]); a_b1 = np.full(HIDDEN_SIZES[1], 0.1)
    a_wl = 0.01 * np.asarray(jax.random.normal(keys[2], (HIDDEN_SIZES[1], OUTPUT_SIZE),
                                               jnp.float32), np.float64)
    a_bl = np.zeros(OUTPUT_SIZE)
    # critic: Linear(num_inputs,3H) / Linear(3H,3H) / Linear(3H,1), biases 0
    c_w1 = fanin(keys[3], NUM_INPUTS, CRITIC_W); c_b1 = np.zeros(CRITIC_W)
    c_w2 = fanin(keys[4], CRITIC_W, CRITIC_W);   c_b2 = np.zeros(CRITIC_W)
    c_w3 = fanin(keys[5], CRITIC_W, 1);          c_b3 = np.zeros(1)

    raw = dict(a_w0=a_w0, a_b0=a_b0, a_w1=a_w1, a_b1=a_b1, a_wl=a_wl, a_bl=a_bl,
               c_w1=c_w1, c_b1=c_b1, c_w2=c_w2, c_b2=c_b2, c_w3=c_w3, c_b3=c_b3)

    # fused / block-diagonal trunk weights (critic lanes [0:96), actor lanes [96:128))
    W1 = np.zeros((NUM_INPUTS, TRUNK_W)); W1[:, :CRITIC_W] = c_w1; W1[:, CRITIC_W:] = a_w0
    b1 = np.concatenate([c_b1, a_b0])[None, :]
    W2 = np.zeros((TRUNK_W, TRUNK_W))
    W2[:CRITIC_W, :CRITIC_W] = c_w2; W2[CRITIC_W:, CRITIC_W:] = a_w1
    b2 = np.concatenate([c_b2, a_b1])[None, :]
    W3 = np.zeros((TRUNK_W, COMB_W))
    W3[CRITIC_W:, :OUTPUT_SIZE] = a_wl; W3[:CRITIC_W, OUTPUT_SIZE:] = c_w3
    b3 = np.concatenate([a_bl, c_b3])[None, :]

    EV, EX, EC, MF, EG, EY = _build_fused_constants(*_dmp_affine_coeffs())

    fused = tuple(jnp.asarray(m, jnp.float32)
                  for m in (W1, b1, W2, b2, W3, b3, EV, EX, EC, MF, EG, EY))
    return fused, raw


# --------------------------------- forward (DMPMLPBase) ---------------------------
def dmp_mlp_base_forward(fused, inputs, rnn_hxs, masks):
    del masks                                             # unused when not recurrent
    critic, actor_flat = fused_forward_call(inputs, fused)
    hidden_actor = actor_flat.reshape(inputs.shape[0], DIM, T_STEPS)   # free reshape
    return critic, hidden_actor, rnn_hxs


# --------------------------------- float64 reference (original formulation) -------
def reference_forward_np(raw, x):
    x = np.asarray(x, np.float64)
    h = np.tanh(x @ raw['c_w1'] + raw['c_b1'])
    h = np.tanh(h @ raw['c_w2'] + raw['c_b2'])
    v = h @ raw['c_w3'] + raw['c_b3']
    critic = np.repeat(v, T_STEPS, axis=1)

    a = np.tanh(x @ raw['a_w0'] + raw['a_b0'])
    a = np.tanh(a @ raw['a_w1'] + raw['a_b1'])
    out = (a @ raw['a_wl'] + raw['a_bl']) * 100.0
    goal = out[:, :DIM].reshape(-1)
    w = out[:, DIM:DIM * (N_BASIS + 1)].reshape(-1, N_BASIS)
    y0 = x[:, STATE_LO:STATE_HI].reshape(-1)
    dy0 = x[:, VEL_LO:VEL_HI].reshape(-1)

    psi_scaled = _dmp_basis()
    y = y0.copy(); z = dy0 * TAU
    ys = [y.copy()]
    for i in range(TIMESTEPS - 1):
        fx = (psi_scaled[i] * w).sum(axis=1) * (goal - y0)
        ddy = A_Z * ((A_Z / 4.0) * (goal - y) - z) + fx
        dz = ddy * TAU
        dy = z * TAU
        y = y + dy * DT
        z = z + dz * DT
        ys.append(y.copy())
    Y = np.stack(ys, axis=0)                              # [T*l+1, B*DIM]
    Yd = Y[::L_SUB]                                       # [T+1,   B*DIM]
    act = (Yd[1:] - Yd[:-1]).T.reshape(x.shape[0], DIM, T_STEPS)
    return critic, act


# --------------------------------- main --------------------------------------------
if __name__ == "__main__":
    key = jax.random.PRNGKey(0)
    k_params, k_x = jax.random.split(key)
    fused, raw = make_params(k_params)

    inputs = jax.random.normal(k_x, (B, NUM_INPUTS), jnp.float32)
    rnn_hxs = jnp.zeros((B, 1), jnp.float32)   # recurrent_hidden_state_size = 1
    masks = jnp.ones((B, 1), jnp.float32)

    fwd = jax.jit(dmp_mlp_base_forward)
    critic, hidden_actor, rnn_hxs_out = fwd(fused, inputs, rnn_hxs, masks)
    jax.block_until_ready((critic, hidden_actor, rnn_hxs_out))

    assert critic.shape == (B, T_STEPS)
    assert hidden_actor.shape == (B, DIM, T_STEPS)
    assert rnn_hxs_out.shape == (B, 1)

    # numerical check against a float64 numpy implementation of the original
    # layer-by-layer / 100-step Euler formulation
    ref_critic, ref_actor = reference_forward_np(raw, np.asarray(inputs))
    np.testing.assert_allclose(np.asarray(critic), ref_critic, rtol=5e-3, atol=5e-3)
    np.testing.assert_allclose(np.asarray(hidden_actor), ref_actor, rtol=5e-3, atol=5e-3)

    print("KERNEL_OK")
</pallas_src>

<mosaic_0001>
module attributes {stable_mosaic.version = 11 : i64} {
  func.func @fused_kernel(%arg0: memref<2x32xf32, #tpu.memory_space<vmem>>, %arg1: memref<32x128xf32, #tpu.memory_space<vmem>>, %arg2: memref<1x128xf32, #tpu.memory_space<vmem>>, %arg3: memref<128x128xf32, #tpu.memory_space<vmem>>, %arg4: memref<1x128xf32, #tpu.memory_space<vmem>>, %arg5: memref<128x55xf32, #tpu.memory_space<vmem>>, %arg6: memref<1x55xf32, #tpu.memory_space<vmem>>, %arg7: memref<55x10xf32, #tpu.memory_space<vmem>>, %arg8: memref<32x90xf32, #tpu.memory_space<vmem>>, %arg9: memref<55x90xf32, #tpu.memory_space<vmem>>, %arg10: memref<55x90xf32, #tpu.memory_space<vmem>>, %arg11: memref<55x90xf32, #tpu.memory_space<vmem>>, %arg12: memref<32x90xf32, #tpu.memory_space<vmem>>, %arg13: memref<2x10xf32, #tpu.memory_space<vmem>>, %arg14: memref<2x90xf32, #tpu.memory_space<vmem>>) attributes {dimension_semantics = [], scalar_prefetch = 0 : i64, scratch_operands = 0 : i64, tpu.core_type = #tpu.core_type<tc>} {
    %c0 = arith.constant 0 : index
    %c0_0 = arith.constant 0 : index
    %0 = vector.load %arg0[%c0, %c0_0] : memref<2x32xf32, #tpu.memory_space<vmem>>, vector<2x32xf32>
    %c0_1 = arith.constant 0 : index
    %c0_2 = arith.constant 0 : index
    %1 = vector.load %arg1[%c0_1, %c0_2] : memref<32x128xf32, #tpu.memory_space<vmem>>, vector<32x128xf32>
    %cst = arith.constant dense<0.000000e+00> : vector<2x128xf32>
    %2 = tpu.matmul %0, %1, %cst {dimension_numbers = #tpu.dot_dimension_numbers<[1], [0], [0], [1], [0, 0, 1, 1], [], []>} : vector<2x32xf32>, vector<32x128xf32>, vector<2x128xf32> -> vector<2x128xf32>
    %c0_3 = arith.constant 0 : index
    %c0_4 = arith.constant 0 : index
    %3 = vector.load %arg2[%c0_3, %c0_4] : memref<1x128xf32, #tpu.memory_space<vmem>>, vector<1x128xf32>
    %4 = vector.broadcast %3 : vector<1x128xf32> to vector<2x128xf32>
    %5 = arith.addf %2, %4 : vector<2x128xf32>
    %6 = math.tanh %5 : vector<2x128xf32>
    %c0_5 = arith.constant 0 : index
    %c0_6 = arith.constant 0 : index
    %7 = vector.load %arg3[%c0_5, %c0_6] : memref<128x128xf32, #tpu.memory_space<vmem>>, vector<128x128xf32>
    %cst_7 = arith.constant dense<0.000000e+00> : vector<2x128xf32>
    %8 = tpu.matmul %6, %7, %cst_7 {dimension_numbers = #tpu.dot_dimension_numbers<[1], [0], [0], [1], [0, 0, 1, 1], [], []>} : vector<2x128xf32>, vector<128x128xf32>, vector<2x128xf32> -> vector<2x128xf32>
    %c0_8 = arith.constant 0 : index
    %c0_9 = arith.constant 0 : index
    %9 = vector.load %arg4[%c0_8, %c0_9] : memref<1x128xf32, #tpu.memory_space<vmem>>, vector<1x128xf32>
    %10 = vector.broadcast %9 : vector<1x128xf32> to vector<2x128xf32>
    %11 = arith.addf %8, %10 : vector<2x128xf32>
    %12 = math.tanh %11 : vector<2x128xf32>
    %c0_10 = arith.constant 0 : index
    %c0_11 = arith.constant 0 : index
    %13 = vector.load %arg5[%c0_10, %c0_11] : memref<128x55xf32, #tpu.memory_space<vmem>>, vector<128x55xf32>
    %cst_12 = arith.constant dense<0.000000e+00> : vector<2x55xf32>
    %14 = tpu.matmul %12, %13, %cst_12 {dimension_numbers = #tpu.dot_dimension_numbers<[1], [0], [0], [1], [0, 0, 1, 1], [], []>} : vector<2x128xf32>, vector<128x55xf32>, vector<2x55xf32> -> vector<2x55xf32>
    %c0_13 = arith.constant 0 : index
    %c0_14 = arith.constant 0 : index
    %15 = vector.load %arg6[%c0_13, %c0_14] : memref<1x55xf32, #tpu.memory_space<vmem>>, vector<1x55xf32>
    %16 = vector.broadcast %15 : vector<1x55xf32> to vector<2x55xf32>
    %17 = arith.addf %14, %16 : vector<2x55xf32>
    %c0_15 = arith.constant 0 : index
    %c0_16 = arith.constant 0 : index
    %18 = vector.load %arg7[%c0_15, %c0_16] : memref<55x10xf32, #tpu.memory_space<vmem>>, vector<55x10xf32>
    %cst_17 = arith.constant dense<0.000000e+00> : vector<2x10xf32>
    %19 = tpu.matmul %17, %18, %cst_17 {dimension_numbers = #tpu.dot_dimension_numbers<[1], [0], [0], [1], [0, 0, 1, 1], [], []>} : vector<2x55xf32>, vector<55x10xf32>, vector<2x10xf32> -> vector<2x10xf32>
    %c0_18 = arith.constant 0 : index
    %c0_19 = arith.constant 0 : index
    %20 = vector.load %arg13[%c0_18, %c0_19] : memref<2x10xf32, #tpu.memory_space<vmem>>, vector<2x10xf32>
    tpu.vector_store %arg13[%c0_18, %c0_19], %19 {strides = array<i32>} : memref<2x10xf32, #tpu.memory_space<vmem>>, vector<2x10xf32>,
    %c0_20 = arith.constant 0 : index
    %c0_21 = arith.constant 0 : index
    %21 = vector.load %arg8[%c0_20, %c0_21] : memref<32x90xf32, #tpu.memory_space<vmem>>, vector<32x90xf32>
    %cst_22 = arith.constant dense<0.000000e+00> : vector<2x90xf32>
    %22 = tpu.matmul %0, %21, %cst_22 {dimension_numbers = #tpu.dot_dimension_numbers<[1], [0], [0], [1], [0, 0, 1, 1], [], []>} : vector<2x32xf32>, vector<32x90xf32>, vector<2x90xf32> -> vector<2x90xf32>
    %c0_23 = arith.constant 0 : index
    %c0_24 = arith.constant 0 : index
    %23 = vector.load %arg9[%c0_23, %c0_24] : memref<55x90xf32, #tpu.memory_space<vmem>>, vector<55x90xf32>
    %cst_25 = arith.constant dense<0.000000e+00> : vector<2x90xf32>
    %24 = tpu.matmul %17, %23, %cst_25 {dimension_numbers = #tpu.dot_dimension_numbers<[1], [0], [0], [1], [0, 0, 1, 1], [], []>} : vector<2x55xf32>, vector<55x90xf32>, vector<2x90xf32> -> vector<2x90xf32>
    %25 = arith.addf %22, %24 : vector<2x90xf32>
    %c0_26 = arith.constant 0 : index
    %c0_27 = arith.constant 0 : index
    %26 = vector.load %arg10[%c0_26, %c0_27] : memref<55x90xf32, #tpu.memory_space<vmem>>, vector<55x90xf32>
    %cst_28 = arith.constant dense<0.000000e+00> : vector<2x90xf32>
    %27 = tpu.matmul %17, %26, %cst_28 {dimension_numbers = #tpu.dot_dimension_numbers<[1], [0], [0], [1], [0, 0, 1, 1], [], []>} : vector<2x55xf32>, vector<55x90xf32>, vector<2x90xf32> -> vector<2x90xf32>
    %c0_29 = arith.constant 0 : index
    %c0_30 = arith.constant 0 : index
    %28 = vector.load %arg11[%c0_29, %c0_30] : memref<55x90xf32, #tpu.memory_space<vmem>>, vector<55x90xf32>
    %cst_31 = arith.constant dense<0.000000e+00> : vector<2x90xf32>
    %29 = tpu.matmul %17, %28, %cst_31 {dimension_numbers = #tpu.dot_dimension_numbers<[1], [0], [0], [1], [0, 0, 1, 1], [], []>} : vector<2x55xf32>, vector<55x90xf32>, vector<2x90xf32> -> vector<2x90xf32>
    %c0_32 = arith.constant 0 : index
    %c0_33 = arith.constant 0 : index
    %30 = vector.load %arg12[%c0_32, %c0_33] : memref<32x90xf32, #tpu.memory_space<vmem>>, vector<32x90xf32>
    %cst_34 = arith.constant dense<0.000000e+00> : vector<2x90xf32>
    %31 = tpu.matmul %0, %30, %cst_34 {dimension_numbers = #tpu.dot_dimension_numbers<[1], [0], [0], [1], [0, 0, 1, 1], [], []>} : vector<2x32xf32>, vector<32x90xf32>, vector<2x90xf32> -> vector<2x90xf32>
    %32 = arith.subf %29, %31 : vector<2x90xf32>
    %33 = arith.mulf %27, %32 : vector<2x90xf32>
    %34 = arith.addf %25, %33 : vector<2x90xf32>
    %c0_35 = arith.constant 0 : index
    %c0_36 = arith.constant 0 : index
    %35 = vector.load %arg14[%c0_35, %c0_36] : memref<2x90xf32, #tpu.memory_space<vmem>>, vector<2x90xf32>
    tpu.vector_store %arg14[%c0_35, %c0_36], %34 {strides = array<i32>} : memref<2x90xf32, #tpu.memory_space<vmem>>, vector<2x90xf32>,
    return
  }
}

</mosaic_0001>

<bundles_post_ra>
// kernel: dmp_mlp_base_forward.1
= control target key start
LH: loop header
LB: loop body
LE: loop exit
PB: predicated region body
PF: predicated region fallthrough
CT: control target
= control target key end

     0   :  { %20 = vsyncpa [#allocation3], 0  ;;  %s1735_s0 = inlined_call_operand.vmem [shape: f32[2,32], index: 0, kind: input, shape index: {}]   ;;  %s1736_s1 = inlined_call_operand.vmem [shape: f32[32,128], index: 1, kind: input, shape index: {}]   ;;  %s1737_s2 = inlined_call_operand.hbm [shape: f32[1,128], index: 2, kind: input, shape index: {}]   ;;  %s1738_s3 = inlined_call_operand.vmem [shape: f32[128,128], index: 3, kind: input, shape index: {}]   ;;  %s1739_s4 = inlined_call_operand.hbm [shape: f32[1,128], index: 4, kind: input, shape index: {}]   ;;  %s1740_s5 = inlined_call_operand.vmem [shape: f32[128,55], index: 5, kind: input, shape index: {}]   ;;  %s1741_s6 = inlined_call_operand.hbm [shape: f32[1,55], index: 6, kind: input, shape index: {}]   ;;  %s1742_s7 = inlined_call_operand.vmem [shape: f32[55,10], index: 7, kind: input, shape index: {}]   ;;  %s1743_s8 = inlined_call_operand.hbm [shape: f32[32,90], index: 8, kind: input, shape index: {}]   ;;  %s1744_s9 = inlined_call_operand.vmem [shape: f32[55,90], index: 9, kind: input, shape index: {}]   ;;  %s1745_s10 = inlined_call_operand.vmem [shape: f32[55,90], index: 10, kind: input, shape index: {}]   ;;  %s1746_s11 = inlined_call_operand.hbm [shape: f32[55,90], index: 11, kind: input, shape index: {}]   ;;  %s1747_s12 = inlined_call_operand.hbm [shape: f32[32,90], index: 12, kind: input, shape index: {}]   ;;  %s1748_s13 = inlined_call_operand.hbm [shape: f32[2,10], index: 13, kind: output, shape index: {0}]   ;;  %s1749_s14 = inlined_call_operand.vmem [shape: f32[2,90], index: 14, kind: output, shape index: {1}]  }
   0x1   :  { %21 = vsyncpa [#allocation6], 0 }
   0x2   :  { %22 = vsyncpa [#allocation9], 0 }
   0x3   :  { %23 = vsyncpa [#allocation12], 0 }
   0x4   :  { %24 = vsyncpa [#allocation4], 0  ;;  %s1330_s29 = smov [#allocation5]   ;;  %s1331_s15 = smov [#allocation8]  }
   0x5   :  { %s47_s30 = sshll.u32 %s1330_s29, 4  ;;  %s70_s16 = sshll.u32 %s1331_s15, 4  ;;  %s48_s30 = int_to_ptr.vmem [resolvable:$true] %s47_s30  ;;  %s71_s16 = int_to_ptr.vmem [resolvable:$true] %s70_s16 }
   0x6   :  { %s1188_s17 = scalar_lea.vmem %s48_s30, 16  ;;  %s1192_s18 = scalar_lea.vmem %s48_s30, 32 }
   0x7   :  { %p1189_p0 = scmp.ne.s32.totalorder %s48_s30, %s1188_s17  ;;  %p1193_p1 = scmp.lt.s32.totalorder %s48_s30, %s48_s30 }
   0x8   :  { %p1194_p2 = scmp.lt.s32.totalorder %s1192_s18, %s1188_s17 }
   0xa   :  { %p1195_p3 = por %p1194_p2, %p1193_p1 }
   0xc   :  { %p1196_p4 = pnand %p1195_p3, %p1189_p0 }
   0xe   :  { %1199 = shalt.err (!%p1196_p4)
}
   0xf   :  { %50 = dma.hbm_to_vmem [thread:$0]  %s1739_s4, 16, %s48_s30, [#allocation6]  }
  0x10   :  { %s1208_s21 = scalar_lea.vmem %s71_s16, 512  ;;  %p1213_p6 = scmp.lt.s32.totalorder %s71_s16, %s71_s16 }
  0x11   :  { %p1209_p5 = scmp.ne.s32.totalorder %s71_s16, %s1208_s21  ;;  %p1214_p7 = scmp.lt.s32.totalorder %s1208_s21, %s1208_s21 }
  0x13   :  { %p1215_p8 = por %p1214_p7, %p1213_p6 }
  0x15   :  { %p1216_p9 = pnand %p1215_p8, %p1209_p5 }
  0x17   :  { %1219 = shalt.err (!%p1216_p9)
}
  0x18   :  { %s1332_s22 = smov 128   ;;  %s1333_s23 = smov 8  }
  0x19   :  { %76 = dma.hbm_to_vmem [thread:$0]  %s1743_s8, 512, %s71_s16, [#allocation9], %s1332_s22, %s1332_s22, %s1333_s23  }
  0x1a   :  { %s1334_s26 = smov [#allocation2]   ;;  %s1335_s28 = smov [#allocation7]  }
  0x1b   :  { %s35_s27 = sshll.u32 %s1334_s26, 4  ;;  %s59_s4 = sshll.u32 %s1335_s28, 4  ;;  %s36_s27 = int_to_ptr.vmem [resolvable:$true] %s35_s27  ;;  %s60_s4 = int_to_ptr.vmem [resolvable:$true] %s59_s4 }
  0x1c   :  { %s1228_s29 = scalar_lea.vmem %s36_s27, 16  ;;  %s1232_s30 = scalar_lea.vmem %s36_s27, 32 }
  0x1d   :  { %p1229_p10 = scmp.ne.s32.totalorder %s36_s27, %s1228_s29  ;;  %p1233_p11 = scmp.lt.s32.totalorder %s36_s27, %s36_s27 }
  0x1e   :  { %p1234_p12 = scmp.lt.s32.totalorder %s1232_s30, %s1228_s29 }
  0x20   :  { %p1235_p13 = por %p1234_p12, %p1233_p11 }
  0x22   :  { %p1236_p0 = pnand %p1235_p13, %p1229_p10 }
  0x24   :  { %1239 = shalt.err (!%p1236_p0)
}
  0x25   :  { %38 = dma.hbm_to_vmem [thread:$0]  %s1737_s2, 16, %s36_s27, [#allocation3]  }
  0x26   :  { %s1248_s18 = scalar_lea.vmem %s60_s4, 16  ;;  %s1252_s8 = scalar_lea.vmem %s60_s4, 32 }
  0x27   :  { %p1249_p1 = scmp.ne.s32.totalorder %s60_s4, %s1248_s18  ;;  %p1253_p2 = scmp.lt.s32.totalorder %s60_s4, %s60_s4 }
  0x28   :  { %p1254_p3 = scmp.lt.s32.totalorder %s1252_s8, %s1248_s18 }
  0x2a   :  { %p1255_p4 = por %p1254_p3, %p1253_p2 }
  0x2c   :  { %p1256_p5 = pnand %p1255_p4, %p1249_p1 }
  0x2e   :  { %1259 = shalt.err (!%p1256_p5)
}
  0x2f   :  { %62 = dma.hbm_to_vmem [thread:$0]  %s1741_s6, 16, %s60_s4, [#allocation6]  }
  0x30   :  { %s1336_s20 = smov [#allocation10]   ;;  %s1337_s24 = smov [#allocation11]  }
  0x31   :  { %s86_s21 = sshll.u32 %s1336_s20, 4  ;;  %s98_s25 = sshll.u32 %s1337_s24, 4  ;;  %s87_s21 = int_to_ptr.vmem [resolvable:$true] %s86_s21  ;;  %s99_s25 = int_to_ptr.vmem [resolvable:$true] %s98_s25 }
  0x32   :  { %s1268_s26 = scalar_lea.vmem %s87_s21, 896  ;;  %p1273_p7 = scmp.lt.s32.totalorder %s87_s21, %s87_s21 }
  0x33   :  { %p1269_p6 = scmp.ne.s32.totalorder %s87_s21, %s1268_s26  ;;  %p1274_p8 = scmp.lt.s32.totalorder %s1268_s26, %s1268_s26 }
  0x35   :  { %p1275_p9 = por %p1274_p8, %p1273_p7 }
  0x37   :  { %p1276_p10 = pnand %p1275_p9, %p1269_p6 }
  0x39   :  { %1279 = shalt.err (!%p1276_p10)
}
  0x3a   :  { %92 = dma.hbm_to_vmem [thread:$0]  %s1746_s11, 896, %s87_s21, [#allocation9], %s1332_s22, %s1332_s22, %s1333_s23  }
  0x3b   :  { %s1288_s6 = scalar_lea.vmem %s99_s25, 512  ;;  %p1293_p12 = scmp.lt.s32.totalorder %s99_s25, %s99_s25 }
  0x3c   :  { %p1289_p11 = scmp.ne.s32.totalorder %s99_s25, %s1288_s6  ;;  %p1294_p13 = scmp.lt.s32.totalorder %s1288_s6, %s1288_s6 }
  0x3e   :  { %p1295_p0 = por %p1294_p13, %p1293_p12 }
  0x40   :  { %p1296_p1 = pnand %p1295_p0, %p1289_p11 }
  0x42   :  { %1299 = shalt.err (!%p1296_p1)
}
  0x43   :  { %104 = dma.hbm_to_vmem [thread:$0]  %s1747_s12, 512, %s99_s25, [#allocation12], %s1332_s22, %s1332_s22, %s1333_s23  }
  0x44   :  { %1320 = dma.done.wait [#allocation3], 16  }
  0x45   :  { %1321 = vsyncadd [#allocation3], 4294967280 }
  0x46   :  { %1322 = dma.done.wait [#allocation6], 32  }
  0x47   :  { %1323 = vsyncadd [#allocation6], 4294967264 }
  0x48   :  { %1324 = dma.done.wait [#allocation9], 1408  }
  0x49   :  { %1325 = vsyncadd [#allocation9], 4294965888 }
  0x4a   :  { %1326 = dma.done.wait [#allocation12], 512  }
  0x4b   :  { %1327 = vsyncadd [#allocation12], 4294966784  ;;  %v1338_v0 = vmov 0.0   ;;  %vm1339_vm0 = vmmov 0   ;;  %v127_v1 = vld [vmem:[%s1736_s1 + $0x18] sm:$0xff]  ;;  %v126_v2 = vld [vmem:[%s1736_s1 + $0x10] sm:$0xff] }
  0x4c   :  { %994 = vmatprep.subr.mxu0 %v1338_v0  ;;  %1002 = vmatprep.mubr.msk.f32.mxu0 %vm1339_vm0, %v1338_v0  ;;  %v225_v3 = vld [vmem:[%s1738_s3 + $0x78] sm:$0xff]  ;;  %v125_v4 = vld [vmem:[%s1736_s1 + $0x8] sm:$0xff]  ;;  %v224_v5 = vld [vmem:[%s1738_s3 + $0x70] sm:$0xff]  ;;  %vm135_vm1 = vcmask 261120   ;;  %vm408_vm2 = vcmask 1046528   ;;  %vm404_vm3 = vcmask 449536  }
  0x4d   :  { %1005 = vmatprep.subr.mxu1 %v1338_v0  ;;  %1037 = vmatprep.mubr.msk.f32.mxu1 %vm1339_vm0, %v1338_v0  ;;  %v223_v6 = vld [vmem:[%s1738_s3 + $0x68] sm:$0xff]  ;;  %v124_v7 = vld [vmem:[%s1736_s1] sm:$0xff]  ;;  %v221_v10 = vld [vmem:[%s1738_s3 + $0x58] sm:$0xff]  ;;  %vm482_vm4 = vcmask 74752  }
  0x4e   :  { %995 = vmatpush3.msra.mxu0 %v127_v1  ;;  %1006 = vmatpush3.msra.mxu1 %v225_v3  ;;  %v1476_v8 = vld [vmem:[%s1735_s0] sm:$0x3]  ;;  %v220_v11 = vld [vmem:[%s1738_s3 + $0x50] sm:$0xff]  ;;  %v219_v12 = vld [vmem:[%s1738_s3 + $0x48] sm:$0xff] }
  0x4f   :  { %996 = vmatprep.subr.mxu0 %v1338_v0  ;;  %1007 = vmatprep.subr.mxu1 %v1338_v0  ;;  %v222_v9 = vld [vmem:[%s1738_s3 + $0x60] sm:$0xff]  ;;  %v217_v14 = vld [vmem:[%s1738_s3 + $0x38] sm:$0xff]  ;;  %v216_v15 = vld [vmem:[%s1738_s3 + $0x30] sm:$0xff] }
  0x50   :  { %997 = vmatpush3.msra.mxu0 %v126_v2  ;;  %1008 = vmatpush3.msra.mxu1 %v224_v5  ;;  %v218_v13 = vld [vmem:[%s1738_s3 + $0x40] sm:$0xff]  ;;  %v215_v16 = vld [vmem:[%s1738_s3 + $0x28] sm:$0xff]  ;;  %v213_v18 = vld [vmem:[%s1738_s3 + $0x18] sm:$0xff] }
  0x51   :  { %998 = vmatprep.subr.mxu0 %v1338_v0  ;;  %1009 = vmatprep.subr.mxu1 %v1338_v0  ;;  %v214_v17 = vld [vmem:[%s1738_s3 + $0x20] sm:$0xff]  ;;  %v212_v19 = vld [vmem:[%s1738_s3 + $0x10] sm:$0xff]  ;;  %v211_v20 = vld [vmem:[%s1738_s3 + $0x8] sm:$0xff] }
  0x52   :  { %999 = vmatpush3.msra.mxu0 %v125_v4  ;;  %1010 = vmatpush3.msra.mxu1 %v223_v6  ;;  %v210_v21 = vld [vmem:[%s1738_s3] sm:$0xff]  ;;  %v319_v22 = vld [vmem:[%s1740_s5 + $0x78] sm:$0xff]  ;;  %v318_v23 = vld [vmem:[%s1740_s5 + $0x70] sm:$0xff] }
  0x53   :  { %1000 = vmatprep.subr.mxu0 %v1338_v0  ;;  %1011 = vmatprep.subr.mxu1 %v1338_v0  ;;  %v317_v24 = vld [vmem:[%s1740_s5 + $0x68] sm:$0xff]  ;;  %v316_v25 = vld [vmem:[%s1740_s5 + $0x60] sm:$0xff]  ;;  %v315_v26 = vld [vmem:[%s1740_s5 + $0x58] sm:$0xff] }
  0x54   :  { %1001 = vmatpush3.msra.mxu0 %v124_v7  ;;  %1012 = vmatpush3.msra.mxu1 %v222_v9  ;;  %v314_v27 = vld [vmem:[%s1740_s5 + $0x50] sm:$0xff]  ;;  %v313_v28 = vld [vmem:[%s1740_s5 + $0x48] sm:$0xff]  ;;  %v899_v29 = vld [vmem:[#allocation2] ss:$0 sm:$0xff] }
  0x55   :  { %1003 = vmatmul.mubr.msk.f32.vlgmr.msra.gmra.mxu0 %vm135_vm1, %v1476_v8  ;;  %1013 = vmatprep.subr.mxu1 %v1338_v0  ;;  %v312_v34 = vld [vmem:[%s1740_s5 + $0x40] sm:$0xff]  ;;  %v311_v35 = vld [vmem:[%s1740_s5 + $0x38] sm:$0xff]  ;;  %v310_v36 = vld [vmem:[%s1740_s5 + $0x30] sm:$0xff] }
  0x56   :  { %1040 = vmatprep.subr.mxu0 %v1338_v0  ;;  %1014 = vmatpush3.msra.mxu1 %v221_v10  ;;  %v309_v37 = vld [vmem:[%s1740_s5 + $0x28] sm:$0xff]  ;;  %v308_v38 = vld [vmem:[%s1740_s5 + $0x20] sm:$0xff]  ;;  %v307_v39 = vld [vmem:[%s1740_s5 + $0x18] sm:$0xff] }
  0x57   :  { %1072 = vmatprep.mubr.msk.f32.mxu0 %vm1339_vm0, %v1338_v0  ;;  %1015 = vmatprep.subr.mxu1 %v1338_v0  ;;  %v306_v40 = vld [vmem:[%s1740_s5 + $0x10] sm:$0xff]  ;;  %v305_v41 = vld [vmem:[%s1740_s5 + $0x8] sm:$0xff]  ;;  %v304_v42 = vld [vmem:[%s1740_s5] sm:$0xff] }
  0x58   :  { %1016 = vmatpush3.msra.mxu1 %v220_v11  ;;  %1041 = vmatpush3.msra.mxu0 %v319_v22  ;;  %v403_v43 = vld [vmem:[%s1742_s7 + $0x30] sm:$0x7f]  ;;  %v402_v44 = vld [vmem:[%s1742_s7 + $0x28] sm:$0xff]  ;;  %v401_v45 = vld [vmem:[%s1742_s7 + $0x20] sm:$0xff] }
  0x59   :  { %1017 = vmatprep.subr.mxu1 %v1338_v0  ;;  %1042 = vmatprep.subr.mxu0 %v1338_v0  ;;  %v400_v46 = vld [vmem:[%s1742_s7 + $0x18] sm:$0xff]  ;;  %v399_v47 = vld [vmem:[%s1742_s7 + $0x10] sm:$0xff]  ;;  %v398_v48 = vld [vmem:[%s1742_s7 + $0x8] sm:$0xff] }
  0x5a   :  { %1018 = vmatpush3.msra.mxu1 %v219_v12  ;;  %1043 = vmatpush3.msra.mxu0 %v318_v23  ;;  %v901_v49 = vld [vmem:[#allocation5] ss:$0 sm:$0xff]  ;;  %v494_v53 = vld [vmem:[%s1744_s9 + $0x30] sm:$0x7f]  ;;  %v493_v55 = vld [vmem:[%s1744_s9 + $0x28] sm:$0xff] }
  0x5b   :  { %1019 = vmatprep.subr.mxu1 %v1338_v0  ;;  %1044 = vmatprep.subr.mxu0 %v1338_v0  ;;  %v492_v56 = vld [vmem:[%s1744_s9 + $0x20] sm:$0xff]  ;;  %v491_v57 = vld [vmem:[%s1744_s9 + $0x18] sm:$0xff]  ;;  %v490_v58 = vld [vmem:[%s1744_s9 + $0x10] sm:$0xff] }
  0x5c   :  { %1020 = vmatpush3.msra.mxu1 %v218_v13  ;;  %1045 = vmatpush3.msra.mxu0 %v317_v24  ;;  %v489_v59 = vld [vmem:[%s1744_s9 + $0x8] sm:$0xff]  ;;  %v397_v60 = vld [vmem:[%s1742_s7] sm:$0xff]  ;;  %v644_v3 = vld [vmem:[%s1745_s10 + $0x30] sm:$0x7f] }
  0x5d   :  { %1021 = vmatprep.subr.mxu1 %v1338_v0  ;;  %1046 = vmatprep.subr.mxu0 %v1338_v0  ;;  %v488_v61 = vld [vmem:[%s1744_s9] sm:$0xff]  ;;  %v486_v5 = vld [vmem:[#allocation8 + $0x10] sm:$0xff]  ;;  %v643_v6 = vld [vmem:[%s1745_s10 + $0x28] sm:$0xff] }
  0x5e   :  { %1022 = vmatpush3.msra.mxu1 %v217_v14  ;;  %1047 = vmatpush3.msra.mxu0 %v316_v25  ;;  %v902_v62 = vld [vmem:[#allocation7] ss:$0 sm:$0xff]  ;;  %v485_v7 = vld [vmem:[#allocation8 + $0x8] sm:$0xff]  ;;  %v484_v10 = vld [vmem:[#allocation8] sm:$0xff] }
  0x5f   :  { %1023 = vmatprep.subr.mxu1 %v1338_v0  ;;  %1048 = vmatprep.subr.mxu0 %v1338_v0  ;;  %v487_v2 = vld [vmem:[#allocation8 + $0x18] sm:$0xff]  ;;  %v640_v12 = vld [vmem:[%s1745_s10 + $0x10] sm:$0xff]  ;;  %v639_v14 = vld [vmem:[%s1745_s10 + $0x8] sm:$0xff] }
  0x60   :  { %1024 = vmatpush3.msra.mxu1 %v216_v15  ;;  %1049 = vmatpush3.msra.mxu0 %v315_v26  ;;  %v642_v9 = vld [vmem:[%s1745_s10 + $0x20] sm:$0xff]  ;;  %v641_v11 = vld [vmem:[%s1745_s10 + $0x18] sm:$0xff]  ;;  %v723_v15 = vld [vmem:[#allocation10 + $0x28] sm:$0xff] }
  0x61   :  { %1025 = vmatprep.subr.mxu1 %v1338_v0  ;;  %1050 = vmatprep.subr.mxu0 %v1338_v0  ;;  %v724_v13 = vld [vmem:[#allocation10 + $0x30] sm:$0x7f]  ;;  %v719_v22 = vld [vmem:[#allocation10 + $0x8] sm:$0xff]  ;;  %v799_v23 = vld [vmem:[#allocation11 + $0x8] sm:$0xff] }
  0x62   :  { %1026 = vmatpush3.msra.mxu1 %v215_v16  ;;  %1051 = vmatpush3.msra.mxu0 %v314_v27  ;;  %v638_v16 = vld [vmem:[%s1745_s10] sm:$0xff]  ;;  %s1340_s10 = smov [#allocation13]  }
  0x63   :  { %1027 = vmatprep.subr.mxu1 %v1338_v0  ;;  %1052 = vmatprep.subr.mxu0 %v1338_v0  ;;  %v718_v24 = vld [vmem:[#allocation10] sm:$0xff]  ;;  %v798_v25 = vld [vmem:[#allocation11] sm:$0xff]  ;;  %s883_s21 = sshll.u32 %s1340_s10, 4  ;;  %s884_s21 = int_to_ptr.vmem [resolvable:$true] %s883_s21 }
  0x64   :  { %1028 = vmatpush3.msra.mxu1 %v214_v17  ;;  %1053 = vmatpush3.msra.mxu0 %v313_v28  ;;  %v722_v17 = vld [vmem:[#allocation10 + $0x20] sm:$0xff]  ;;  %s1300_s24 = scalar_lea.vmem %s884_s21, 32  ;;  %p1305_p3 = scmp.lt.s32.totalorder %s884_s21, %s884_s21 }
  0x65   :  { %1029 = vmatprep.subr.mxu1 %v1338_v0  ;;  %1054 = vmatprep.subr.mxu0 %v1338_v0  ;;  %p1301_p2 = scmp.ne.s32.totalorder %s884_s21, %s1300_s24  ;;  %p1306_p4 = scmp.lt.s32.totalorder %s1300_s24, %s1300_s24 }
  0x66   :  { %1030 = vmatpush3.msra.mxu1 %v213_v18  ;;  %1055 = vmatpush3.msra.mxu0 %v312_v34  ;;  %v721_v18 = vld [vmem:[#allocation10 + $0x18] sm:$0xff] }
  0x67   :  { %1031 = vmatprep.subr.mxu1 %v1338_v0  ;;  %1056 = vmatprep.subr.mxu0 %v1338_v0  ;;  %p1307_p5 = por %p1306_p4, %p1305_p3 }
  0x68   :  { %1032 = vmatpush3.msra.mxu1 %v212_v19  ;;  %1057 = vmatpush3.msra.mxu0 %v311_v35  ;;  %v801_v19 = vld [vmem:[#allocation11 + $0x18] sm:$0xff] }
  0x69   :  { %1033 = vmatprep.subr.mxu1 %v1338_v0  ;;  %1058 = vmatprep.subr.mxu0 %v1338_v0  ;;  %p1308_p6 = pnand %p1307_p5, %p1301_p2 }
  0x6a   :  { %1034 = vmatpush3.msra.mxu1 %v211_v20  ;;  %1059 = vmatpush3.msra.mxu0 %v310_v36  ;;  %v720_v20 = vld [vmem:[#allocation10 + $0x10] sm:$0xff] }
  0x6b   :  { %1035 = vmatprep.subr.mxu1 %v1338_v0  ;;  %1060 = vmatprep.subr.mxu0 %v1338_v0 }
  0x6c   :  { %1036 = vmatpush3.msra.mxu1 %v210_v21  ;;  %1061 = vmatpush3.msra.mxu0 %v309_v37  ;;  %v800_v21 = vld [vmem:[#allocation11 + $0x10] sm:$0xff] }
  0x6d   :  { %1075 = vmatprep.subr.mxu1 %v1338_v0  ;;  %1062 = vmatprep.subr.mxu0 %v1338_v0 }
  0x6e   :  { %1063 = vmatpush3.msra.mxu0 %v308_v38 }
  0x6f   :  { %1064 = vmatprep.subr.mxu0 %v1338_v0 }
  0x70   :  { %1065 = vmatpush3.msra.mxu0 %v307_v39 }
  0x71   :  { %1066 = vmatprep.subr.mxu0 %v1338_v0 }
  0x72   :  { %1067 = vmatpush3.msra.mxu0 %v306_v40 }
  0x73   :  { %1068 = vmatprep.subr.mxu0 %v1338_v0 }
  0x74   :  { %1069 = vmatpush3.msra.mxu0 %v305_v41 }
  0x75   :  { %1070 = vmatprep.subr.mxu0 %v1338_v0 }
  0x76   :  { %1071 = vmatpush3.msra.mxu0 %v304_v42 }
  0x77   :  { %1092 = vmatprep.subr.mxu0 %v1338_v0 }
 0x115   :  { %v205_v30 = vpop.f32.mrf.mxu0 }
 0x116   :  { %v206_v31 = vadd.f32 %v899_v29, %v205_v30 }
 0x117   :  { %v1004_v32 = vpop.f32.mrf.mxu0 }
 0x118   :  { %1176 = vtanh.f32 %v206_v31 }
 0x125   :  { %v1177_v33 = vpop.eup %1176 }
 0x126   :  { %1038 = vmatmul.mubr.f32.vlgmr.msra.gmra.mxu1 %v1177_v33 }
 0x127   :  { %1089 = vmatprep.mubr.msk.f32.mxu1 %vm1339_vm0, %v1338_v0  ;;  %1076 = vmatpush3.msk.msra.mxu1 %vm408_vm2, %v403_v43 }
 0x128   :  { %1077 = vmatprep.subr.mxu1 %v1338_v0 }
 0x129   :  { %1078 = vmatpush3.msra.mxu1 %v402_v44 }
 0x12a   :  { %1079 = vmatprep.subr.mxu1 %v1338_v0 }
 0x12b   :  { %1080 = vmatpush3.msra.mxu1 %v401_v45 }
 0x12c   :  { %1081 = vmatprep.subr.mxu1 %v1338_v0 }
 0x12d   :  { %1082 = vmatpush3.msra.mxu1 %v400_v46 }
 0x12e   :  { %1083 = vmatprep.subr.mxu1 %v1338_v0 }
 0x12f   :  { %1084 = vmatpush3.msra.mxu1 %v399_v47 }
 0x130   :  { %1085 = vmatprep.subr.mxu1 %v1338_v0 }
 0x131   :  { %1086 = vmatpush3.msra.mxu1 %v398_v48 }
 0x132   :  { %1087 = vmatprep.subr.mxu1 %v1338_v0 }
 0x133   :  { %1088 = vmatpush3.msra.mxu1 %v397_v60 }
 0x134   :  { %1109 = vmatprep.subr.mxu1 %v1338_v0 }
 0x1e6   :  { %v299_v50 = vpop.f32.mrf.mxu1 }
 0x1e7   :  { %v300_v51 = vadd.f32 %v901_v49, %v299_v50 }
 0x1e8   :  { %v1039_v52 = vpop.f32.mrf.mxu1 }
 0x1e9   :  { %1178 = vtanh.f32 %v300_v51 }
 0x1f6   :  { %v1179_v54 = vpop.eup %1178 }
 0x1f7   :  { %1073 = vmatmul.mubr.f32.vlgmr.msra.gmra.mxu0 %v1179_v54 }
 0x1f8   :  { %1093 = vmatpush3.msk.msra.mxu0 %vm408_vm2, %v494_v53  ;;  %1106 = vmatprep.mubr.msk.f32.mxu0 %vm1339_vm0, %v1338_v0 }
 0x1f9   :  { %1094 = vmatprep.subr.mxu0 %v1338_v0 }
 0x1fa   :  { %1095 = vmatpush3.msra.mxu0 %v493_v55 }
 0x1fb   :  { %1096 = vmatprep.subr.mxu0 %v1338_v0 }
 0x1fc   :  { %1097 = vmatpush3.msra.mxu0 %v492_v56 }
 0x1fd   :  { %1098 = vmatprep.subr.mxu0 %v1338_v0 }
 0x1fe   :  { %1099 = vmatpush3.msra.mxu0 %v491_v57 }
 0x1ff   :  { %1100 = vmatprep.subr.mxu0 %v1338_v0 }
 0x200   :  { %1101 = vmatpush3.msra.mxu0 %v490_v58 }
 0x201   :  { %1102 = vmatprep.subr.mxu0 %v1338_v0 }
 0x202   :  { %1103 = vmatpush3.msra.mxu0 %v489_v59 }
 0x203   :  { %1104 = vmatprep.subr.mxu0 %v1338_v0 }
 0x204   :  { %1105 = vmatpush3.msra.mxu0 %v488_v61 }
 0x205   :  { %1120 = vmatprep.subr.mxu0 %v1338_v0 }
 0x2b7   :  { %v393_v63 = vpop.f32.mrf.mxu0 }
 0x2b8   :  { %v1664_v1 = vadd.f32 %v902_v62, %v393_v63 }
 0x2b9   :  { %v1074_v4 = vpop.f32.mrf.mxu0 }
 0x2ba   :  { %1090 = vmatmul.mubr.msk.f32.vlgmr.msra.gmra.mxu1 %vm404_vm3, %v1664_v1  ;;  %1107 = vmatmul.mubr.msk.f32.vlgmr.msra.gmra.mxu0 %vm404_vm3, %v1664_v1 }
 0x2bb   :  { %1110 = vmatpush3.msra.mxu1 %v487_v2  ;;  %1121 = vmatpush3.msk.msra.mxu0 %vm408_vm2, %v644_v3 }
 0x2bc   :  { %1111 = vmatprep.subr.mxu1 %v1338_v0  ;;  %1122 = vmatprep.subr.mxu0 %v1338_v0 }
 0x2bd   :  { %1112 = vmatpush3.msra.mxu1 %v486_v5  ;;  %1123 = vmatpush3.msra.mxu0 %v643_v6 }
 0x2be   :  { %1113 = vmatprep.subr.mxu1 %v1338_v0  ;;  %1124 = vmatprep.subr.mxu0 %v1338_v0 }
 0x2bf   :  { %1114 = vmatpush3.msra.mxu1 %v485_v7  ;;  %1125 = vmatpush3.msra.mxu0 %v642_v9 }
 0x2c0   :  { %1115 = vmatprep.subr.mxu1 %v1338_v0  ;;  %1126 = vmatprep.subr.mxu0 %v1338_v0 }
 0x2c1   :  { %1116 = vmatpush3.msra.mxu1 %v484_v10  ;;  %1117 = vmatprep.mubr.msk.f32.mxu1 %vm1339_vm0, %v1338_v0 }
 0x2c2   :  { %1127 = vmatpush3.msra.mxu0 %v641_v11  ;;  %1118 = vmatmul.mubr.msk.f32.vlgmr.msra.gmra.mxu1 %vm135_vm1, %v1476_v8 }
 0x2c3   :  { %1128 = vmatprep.subr.mxu0 %v1338_v0  ;;  %1137 = vmatprep.subr.mxu1 %v1338_v0 }
 0x2c4   :  { %1129 = vmatpush3.msra.mxu0 %v640_v12  ;;  %1138 = vmatpush3.msk.msra.mxu1 %vm408_vm2, %v724_v13 }
 0x2c5   :  { %1130 = vmatprep.subr.mxu0 %v1338_v0  ;;  %1139 = vmatprep.subr.mxu1 %v1338_v0 }
 0x2c6   :  { %1131 = vmatpush3.msra.mxu0 %v639_v14  ;;  %1140 = vmatpush3.msra.mxu1 %v723_v15 }
 0x2c7   :  { %1132 = vmatprep.subr.mxu0 %v1338_v0  ;;  %1141 = vmatprep.subr.mxu1 %v1338_v0 }
 0x2c8   :  { %1133 = vmatpush3.msra.mxu0 %v638_v16  ;;  %1134 = vmatprep.mubr.msk.f32.mxu0 %vm1339_vm0, %v1338_v0 }
 0x2c9   :  { %1142 = vmatpush3.msra.mxu1 %v722_v17  ;;  %1135 = vmatmul.mubr.msk.f32.vlgmr.msra.gmra.mxu0 %vm404_vm3, %v1664_v1 }
 0x2ca   :  { %1143 = vmatprep.subr.mxu1 %v1338_v0  ;;  %1154 = vmatprep.subr.mxu0 %v1338_v0 }
 0x2cb   :  { %1144 = vmatpush3.msra.mxu1 %v721_v18  ;;  %1155 = vmatpush3.msra.mxu0 %v801_v19 }
 0x2cc   :  { %1145 = vmatprep.subr.mxu1 %v1338_v0  ;;  %1156 = vmatprep.subr.mxu0 %v1338_v0 }
 0x2cd   :  { %1146 = vmatpush3.msra.mxu1 %v720_v20  ;;  %1157 = vmatpush3.msra.mxu0 %v800_v21 }
 0x2ce   :  { %1147 = vmatprep.subr.mxu1 %v1338_v0  ;;  %1158 = vmatprep.subr.mxu0 %v1338_v0 }
 0x2cf   :  { %1148 = vmatpush3.msra.mxu1 %v719_v22  ;;  %1159 = vmatpush3.msra.mxu0 %v799_v23 }
 0x2d0   :  { %1149 = vmatprep.subr.mxu1 %v1338_v0  ;;  %1160 = vmatprep.subr.mxu0 %v1338_v0 }
 0x2d1   :  { %1150 = vmatpush3.msra.mxu1 %v718_v24  ;;  %1151 = vmatprep.mubr.msk.f32.mxu1 %vm1339_vm0, %v1338_v0 }
 0x2d2   :  { %1161 = vmatpush3.msra.mxu0 %v798_v25  ;;  %1162 = vmatprep.mubr.msk.f32.mxu0 %vm1339_vm0, %v1338_v0 }
 0x2d3   :  { %1152 = vmatmul.mubr.msk.f32.vlgmr.msra.gmra.mxu1 %vm404_vm3, %v1664_v1  ;;  %1163 = vmatmul.mubr.msk.f32.vlgmr.msra.gmra.mxu0 %vm135_vm1, %v1476_v8 }
 0x37a   :  { %v478_v26 = vpop.f32.mrf.mxu1  ;;  %v564_v27 = vpop.f32.mrf.mxu0 }
 0x37b   :  { %483 = vst.msk [vmem:[#allocation13] sm:$0x3] %vm482_vm4, %v478_v26 }
 0x37c   :  { %v1091_v28 = vpop.f32.mrf.mxu1  ;;  %v1108_v29 = vpop.f32.mrf.mxu0 }
 0x37d   :  { %1311 = shalt.err (!%p1308_p6)
}
 0x37e   :  { %886 = dma.vmem_to_hbm [thread:$0]  %s884_s21, 32, %s1748_s13, [#allocation4]   ;;  %vm875_vm5 = vcmask 730112  }
 0x382   :  { %v634_v0 = vpop.f32.mrf.mxu1 }
 0x383   :  { %v635_v37 = vadd.f32 %v634_v0, %v564_v27 }
 0x384   :  { %v1119_v8 = vpop.f32.mrf.mxu1 }
 0x389   :  { %v714_v30 = vpop.f32.mrf.mxu0 }
 0x38b   :  { %v1136_v31 = vpop.f32.mrf.mxu0 }
 0x393   :  { %v794_v32 = vpop.f32.mrf.mxu1  ;;  %v868_v33 = vpop.f32.mrf.mxu0 }
 0x394   :  { %v872_v34 = vsub.f32 %v794_v32, %v868_v33 }
 0x395   :  { %v1153_v35 = vpop.f32.mrf.mxu1  ;;  %v1164_v36 = vpop.f32.mrf.mxu0 }
 0x396   :  { %v873_v38 = vmul.f32 %v872_v34, %v714_v30 }
 0x398   :  { %v874_v39 = vadd.f32 %v873_v38, %v635_v37 }
 0x39a   :  { %876 = vst.msk [vmem:[%s1749_s14] sm:$0x3] %vm875_vm5, %v874_v39 }
 0x39b   :  { %1328 = dma.done.wait [#allocation4], 32  }
 0x39c   :  { %1329 = vsyncadd [#allocation4], 4294967264 }
 0x39d   :  { %894 = vsyncpa [#allocation3], 1 }
 0x39e   :  { %895 = vsyncpa [#allocation6], 1 }
 0x39f   :  { %896 = vsyncpa [#allocation9], 1 }
 0x3a0   :  { %897 = vsyncpa [#allocation12], 1 }
 0x3a1   :  { %898 = vsyncpa [#allocation4], 1 }

</bundles_post_ra>
